<compile_context>
chip_gen: v7x
topology: tpu7x:2x2x1
jax: 0.10.0
libtpu: 0.0.40
codegen_flags: <defaults>
</compile_context>

<pallas_src>
import functools

import jax
import jax.numpy as jnp
from jax.experimental import pallas as pl
from jax.experimental.pallas import tpu as pltpu


_LANES = 128


def _round_up(a: int, b: int) -> int:
    return (a + b - 1) // b * b


# ---------------------------------------------------------------------------
# Kernel 1: spatial-sum pooling over the flattened (B*C, S) view of x.
# ---------------------------------------------------------------------------
def _pool_kernel(x_ref, o_ref):
    """x_ref: (ROW_BLOCK, TILE_S); o_ref: (ROW_BLOCK, 128) partial-sum accumulator."""
    s = pl.program_id(1)

    @pl.when(s == 0)
    def _init():
        o_ref[...] = jnp.zeros_like(o_ref)

    tile_s = x_ref.shape[1]
    lanes = o_ref.shape[1]
    # Fold TILE_S lanes down to 128 with VPU adds (co-issues with the vld slot and
    # hides under the DMA).  The single cross-lane reduction happens in the epilogue.
    partial = x_ref[:, 0:lanes].astype(jnp.float32)
    for i in range(1, tile_s // lanes):
        partial = partial + x_ref[:, i * lanes:(i + 1) * lanes].astype(jnp.float32)
    o_ref[...] += partial


# ---------------------------------------------------------------------------
# Kernel 2: one-shot epilogue — mean, fc1, relu, fc2, temperature, softmax.
# ---------------------------------------------------------------------------
def _make_epilogue_kernel(temperature: float, spatial_size: int):
    inv_temp = 1.0 / float(temperature)
    inv_s = 1.0 / float(spatial_size)

    def kernel(part_ref, w1_ref, w2_ref, o_ref):
        # part_ref: (B, C, 128) lane-wise partial sums of x over the spatial axis.
        pooled = jnp.sum(part_ref[...].astype(jnp.float32), axis=-1) * inv_s  # (B, C)

        # fc1 / fc2 are bias-free 1x1x1 convs == tiny matmuls.  They run once on a
        # few dozen scalars, fully decoupled from the DMA-pipelined pooling kernel.
        h = jnp.dot(pooled, w1_ref[...].astype(jnp.float32),
                    preferred_element_type=jnp.float32)                       # (B, hidden)
        h = jnp.maximum(h, 0.0)
        logits = jnp.dot(h, w2_ref[...].astype(jnp.float32),
                         preferred_element_type=jnp.float32) * inv_temp       # (B, K)

        # numerically stable softmax over dim 1
        logits = logits - jnp.max(logits, axis=-1, keepdims=True)
        e = jnp.exp(logits)
        o_ref[...] = (e / jnp.sum(e, axis=-1, keepdims=True)).astype(o_ref.dtype)

    return kernel


def attention3d_forward(x, w1, w2, temperature):
    """x: (B, C, D, H, W); w1: (hidden, C, 1, 1, 1); w2: (K, hidden, 1, 1, 1)."""
    B, C, D, H, W = x.shape
    hidden = w1.shape[0]
    K = w2.shape[0]
    S = D * H * W
    BC = B * C
    itemsize = x.dtype.itemsize

    # ---- tiling ----
    TILE_S = min(_round_up(S, _LANES), 2048)          # large lane-dense tile
    S_pad = _round_up(S, TILE_S)
    # Rows per block: keep each x buffer <= ~8 MiB so two (double-buffered) tiles
    # fit under the scoped-VMEM limit on every generation (v5e/v6e/v7x).
    max_rows = max(8, ((8 * 1024 * 1024) // (TILE_S * itemsize)) // 8 * 8)
    ROW_BLOCK = min(_round_up(BC, 8), max_rows)
    BC_pad = _round_up(BC, ROW_BLOCK)

    x2 = x.reshape(BC, S)
    if BC_pad != BC or S_pad != S:
        # Fallback for unaligned shapes: zero padding does not perturb the sums;
        # the mean divides by the true S in the epilogue.
        x2 = jnp.pad(x2, ((0, BC_pad - BC), (0, S_pad - S)))

    grid = (BC_pad // ROW_BLOCK, S_pad // TILE_S)     # reduction axis (S) last

    partial = pl.pallas_call(
        _pool_kernel,
        out_shape=jax.ShapeDtypeStruct((BC_pad, _LANES), jnp.float32),
        grid=grid,
        in_specs=[pl.BlockSpec((ROW_BLOCK, TILE_S), lambda r, s: (r, s))],
        out_specs=pl.BlockSpec((ROW_BLOCK, _LANES), lambda r, s: (r, 0)),
        compiler_params=pltpu.CompilerParams(
            dimension_semantics=("parallel", "arbitrary"),
            vmem_limit_bytes=32 * 1024 * 1024,
        ),
        cost_estimate=pl.CostEstimate(
            flops=BC_pad * S_pad,
            transcendentals=0,
            bytes_accessed=BC_pad * S_pad * itemsize + BC_pad * _LANES * 4,
        ),
    )(x2)

    # Layout glue (tiny, 4 KiB): drop row padding, expose (B, C) to the epilogue.
    part_bc = partial[:BC].reshape(B, C, _LANES)
    w1_t = w1.reshape(hidden, C).T                    # (C, hidden)
    w2_t = w2.reshape(K, hidden).T                    # (hidden, K)

    return pl.pallas_call(
        _make_epilogue_kernel(temperature, S),
        out_shape=jax.ShapeDtypeStruct((B, K), jnp.float32),
        in_specs=[
            pl.BlockSpec((B, C, _LANES), lambda: (0, 0, 0)),
            pl.BlockSpec((C, hidden), lambda: (0, 0)),
            pl.BlockSpec((hidden, K), lambda: (0, 0)),
        ],
        out_specs=pl.BlockSpec((B, K), lambda: (0, 0)),
    )(part_bc, w1_t, w2_t)


def _reference(x, w1, w2, temperature):
    hidden = w1.shape[0]
    K = w2.shape[0]
    C = x.shape[1]
    pooled = jnp.mean(x, axis=(2, 3, 4))                        # (B, C)
    h = jnp.maximum(pooled @ w1.reshape(hidden, C).T, 0.0)      # (B, hidden)
    logits = (h @ w2.reshape(K, hidden).T) / temperature        # (B, K)
    return jax.nn.softmax(logits, axis=1)


if __name__ == "__main__":
    # Module hyperparameters (consistent with attention3d.__init__):
    in_planes = 4
    ratios = 0.25
    K = 4
    temperature = 31                                            # temperature % 3 == 1
    hidden_planes = int(in_planes * ratios) + 1 if in_planes != 3 else K   # = 2

    # Small input (B, C, D, H, W); S = 16*16*16 = 4096 -> two reduction grid steps.
    B, D, H, W = 2, 16, 16, 16
    key = jax.random.PRNGKey(0)
    kx, k1, k2 = jax.random.split(key, 3)
    x = jax.random.normal(kx, (B, in_planes, D, H, W), dtype=jnp.float32)
    w1 = jax.random.normal(k1, (hidden_planes, in_planes, 1, 1, 1), dtype=jnp.float32) * 0.5
    w2 = jax.random.normal(k2, (K, hidden_planes, 1, 1, 1), dtype=jnp.float32) * 0.5

    fwd = jax.jit(functools.partial(attention3d_forward, temperature=temperature))
    out = jax.block_until_ready(fwd(x, w1, w2))

    ref = _reference(x, w1, w2, temperature)
    assert out.shape == (B, K)
    assert jnp.allclose(out, ref, atol=1e-5, rtol=1e-5)

    print("KERNEL_OK")
</pallas_src>

<mosaic_0001>
module attributes {stable_mosaic.version = 11 : i64} {
  func.func @kernel(%arg0: memref<2x4x128xf32, #tpu.memory_space<vmem>>, %arg1: memref<4x2xf32, #tpu.memory_space<vmem>>, %arg2: memref<2x4xf32, #tpu.memory_space<vmem>>, %arg3: memref<2x4xf32, #tpu.memory_space<vmem>>) attributes {dimension_semantics = [], scalar_prefetch = 0 : i64, scratch_operands = 0 : i64, tpu.core_type = #tpu.core_type<tc>} {
    %c0 = arith.constant 0 : index
    %c0_0 = arith.constant 0 : index
    %c0_1 = arith.constant 0 : index
    %0 = vector.load %arg0[%c0, %c0_0, %c0_1] : memref<2x4x128xf32, #tpu.memory_space<vmem>>, vector<2x4x128xf32>
    %cst = arith.constant dense<0.000000e+00> : vector<2x4xf32>
    %1 = vector.multi_reduction <add>, %0, %cst [2] : vector<2x4x128xf32> to vector<2x4xf32>
    %cst_2 = arith.constant 2.44140625E-4 : f32
    %2 = vector.broadcast %cst_2 : f32 to vector<2x4xf32>
    %3 = arith.mulf %1, %2 : vector<2x4xf32>
    %c0_3 = arith.constant 0 : index
    %c0_4 = arith.constant 0 : index
    %4 = vector.load %arg1[%c0_3, %c0_4] : memref<4x2xf32, #tpu.memory_space<vmem>>, vector<4x2xf32>
    %cst_5 = arith.constant dense<0.000000e+00> : vector<2x2xf32>
    %5 = tpu.matmul %3, %4, %cst_5 {dimension_numbers = #tpu.dot_dimension_numbers<[1], [0], [0], [1], [0, 0, 1, 1], [], []>} : vector<2x4xf32>, vector<4x2xf32>, vector<2x2xf32> -> vector<2x2xf32>
    %cst_6 = arith.constant 0.000000e+00 : f32
    %6 = vector.broadcast %cst_6 : f32 to vector<2x2xf32>
    %7 = arith.maximumf %5, %6 : vector<2x2xf32>
    %c0_7 = arith.constant 0 : index
    %c0_8 = arith.constant 0 : index
    %8 = vector.load %arg2[%c0_7, %c0_8] : memref<2x4xf32, #tpu.memory_space<vmem>>, vector<2x4xf32>
    %cst_9 = arith.constant dense<0.000000e+00> : vector<2x4xf32>
    %9 = tpu.matmul %7, %8, %cst_9 {dimension_numbers = #tpu.dot_dimension_numbers<[1], [0], [0], [1], [0, 0, 1, 1], [], []>} : vector<2x2xf32>, vector<2x4xf32>, vector<2x4xf32> -> vector<2x4xf32>
    %cst_10 = arith.constant 0.0322580636 : f32
    %10 = vector.broadcast %cst_10 : f32 to vector<2x4xf32>
    %11 = arith.mulf %9, %10 : vector<2x4xf32>
    %cst_11 = arith.constant dense<0xFF800000> : vector<2xf32>
    %12 = vector.multi_reduction <maximumf>, %11, %cst_11 [1] : vector<2x4xf32> to vector<2xf32>
    %13 = vector.shape_cast %12 : vector<2xf32> to vector<2x1xf32>
    %14 = vector.broadcast %13 : vector<2x1xf32> to vector<2x4xf32>
    %15 = arith.subf %11, %14 : vector<2x4xf32>
    %16 = math.exp %15 : vector<2x4xf32>
    %cst_12 = arith.constant dense<0.000000e+00> : vector<2xf32>
    %17 = vector.multi_reduction <add>, %16, %cst_12 [1] : vector<2x4xf32> to vector<2xf32>
    %18 = vector.shape_cast %17 : vector<2xf32> to vector<2x1xf32>
    %19 = vector.broadcast %18 : vector<2x1xf32> to vector<2x4xf32>
    %20 = arith.divf %16, %19 : vector<2x4xf32>
    %c0_13 = arith.constant 0 : index
    %c0_14 = arith.constant 0 : index
    %21 = vector.load %arg3[%c0_13, %c0_14] : memref<2x4xf32, #tpu.memory_space<vmem>>, vector<2x4xf32>
    tpu.vector_store %arg3[%c0_13, %c0_14], %20 {strides = array<i32>} : memref<2x4xf32, #tpu.memory_space<vmem>>, vector<2x4xf32>,
    return
  }
}

module attributes {stable_mosaic.version = 11 : i64} {
  func.func @_pool_kernel(%arg0: i32, %arg1: i32, %arg2: memref<8x2048xf32, #tpu.memory_space<vmem>>, %arg3: memref<8x128xf32, #tpu.memory_space<vmem>>) attributes {dimension_semantics = [#tpu.dimension_semantics<parallel>, #tpu.dimension_semantics<arbitrary>], iteration_bounds = array<i64: 1, 2>, scalar_prefetch = 0 : i64, scratch_operands = 0 : i64, tpu.core_type = #tpu.core_type<tc>, window_params = [{transform_indices = @transform_0, window_bounds = array<i64: 8, 2048>}, {transform_indices = @transform_1, window_bounds = array<i64: 8, 128>}]} {
    %c0_i32 = arith.constant 0 : i32
    %0 = arith.cmpi eq, %arg1, %c0_i32 : i32
    %1 = arith.extui %0 : i1 to i32
    %c0_i32_0 = arith.constant 0 : i32
    %2 = arith.cmpi ne, %1, %c0_i32_0 : i32
    scf.if %2 {
      %cst = arith.constant 0.000000e+00 : f32
      %37 = vector.broadcast %cst : f32 to vector<8x128xf32>
      %c0_21 = arith.constant 0 : index
      %c0_22 = arith.constant 0 : index
      %38 = vector.load %arg3[%c0_21, %c0_22] : memref<8x128xf32, #tpu.memory_space<vmem>>, vector<8x128xf32>
      tpu.vector_store %arg3[%c0_21, %c0_22], %37 {strides = array<i32>} : memref<8x128xf32, #tpu.memory_space<vmem>>, vector<8x128xf32>,
    } else {
    }
    %c0 = arith.constant 0 : index
    %c0_1 = arith.constant 0 : index
    %3 = vector.load %arg2[%c0, %c0_1] : memref<8x2048xf32, #tpu.memory_space<vmem>>, vector<8x128xf32>
    %c0_2 = arith.constant 0 : index
    %c128 = arith.constant 128 : index
    %4 = vector.load %arg2[%c0_2, %c128] : memref<8x2048xf32, #tpu.memory_space<vmem>>, vector<8x128xf32>
    %5 = arith.addf %3, %4 : vector<8x128xf32>
    %c0_3 = arith.constant 0 : index
    %c256 = arith.constant 256 : index
    %6 = vector.load %arg2[%c0_3, %c256] : memref<8x2048xf32, #tpu.memory_space<vmem>>, vector<8x128xf32>
    %7 = arith.addf %5, %6 : vector<8x128xf32>
    %c0_4 = arith.constant 0 : index
    %c384 = arith.constant 384 : index
    %8 = vector.load %arg2[%c0_4, %c384] : memref<8x2048xf32, #tpu.memory_space<vmem>>, vector<8x128xf32>
    %9 = arith.addf %7, %8 : vector<8x128xf32>
    %c0_5 = arith.constant 0 : index
    %c512 = arith.constant 512 : index
    %10 = vector.load %arg2[%c0_5, %c512] : memref<8x2048xf32, #tpu.memory_space<vmem>>, vector<8x128xf32>
    %11 = arith.addf %9, %10 : vector<8x128xf32>
    %c0_6 = arith.constant 0 : index
    %c640 = arith.constant 640 : index
    %12 = vector.load %arg2[%c0_6, %c640] : memref<8x2048xf32, #tpu.memory_space<vmem>>, vector<8x128xf32>
    %13 = arith.addf %11, %12 : vector<8x128xf32>
    %c0_7 = arith.constant 0 : index
    %c768 = arith.constant 768 : index
    %14 = vector.load %arg2[%c0_7, %c768] : memref<8x2048xf32, #tpu.memory_space<vmem>>, vector<8x128xf32>
    %15 = arith.addf %13, %14 : vector<8x128xf32>
    %c0_8 = arith.constant 0 : index
    %c896 = arith.constant 896 : index
    %16 = vector.load %arg2[%c0_8, %c896] : memref<8x2048xf32, #tpu.memory_space<vmem>>, vector<8x128xf32>
    %17 = arith.addf %15, %16 : vector<8x128xf32>
    %c0_9 = arith.constant 0 : index
    %c1024 = arith.constant 1024 : index
    %18 = vector.load %arg2[%c0_9, %c1024] : memref<8x2048xf32, #tpu.memory_space<vmem>>, vector<8x128xf32>
    %19 = arith.addf %17, %18 : vector<8x128xf32>
    %c0_10 = arith.constant 0 : index
    %c1152 = arith.constant 1152 : index
    %20 = vector.load %arg2[%c0_10, %c1152] : memref<8x2048xf32, #tpu.memory_space<vmem>>, vector<8x128xf32>
    %21 = arith.addf %19, %20 : vector<8x128xf32>
    %c0_11 = arith.constant 0 : index
    %c1280 = arith.constant 1280 : index
    %22 = vector.load %arg2[%c0_11, %c1280] : memref<8x2048xf32, #tpu.memory_space<vmem>>, vector<8x128xf32>
    %23 = arith.addf %21, %22 : vector<8x128xf32>
    %c0_12 = arith.constant 0 : index
    %c1408 = arith.constant 1408 : index
    %24 = vector.load %arg2[%c0_12, %c1408] : memref<8x2048xf32, #tpu.memory_space<vmem>>, vector<8x128xf32>
    %25 = arith.addf %23, %24 : vector<8x128xf32>
    %c0_13 = arith.constant 0 : index
    %c1536 = arith.constant 1536 : index
    %26 = vector.load %arg2[%c0_13, %c1536] : memref<8x2048xf32, #tpu.memory_space<vmem>>, vector<8x128xf32>
    %27 = arith.addf %25, %26 : vector<8x128xf32>
    %c0_14 = arith.constant 0 : index
    %c1664 = arith.constant 1664 : index
    %28 = vector.load %arg2[%c0_14, %c1664] : memref<8x2048xf32, #tpu.memory_space<vmem>>, vector<8x128xf32>
    %29 = arith.addf %27, %28 : vector<8x128xf32>
    %c0_15 = arith.constant 0 : index
    %c1792 = arith.constant 1792 : index
    %30 = vector.load %arg2[%c0_15, %c1792] : memref<8x2048xf32, #tpu.memory_space<vmem>>, vector<8x128xf32>
    %31 = arith.addf %29, %30 : vector<8x128xf32>
    %c0_16 = arith.constant 0 : index
    %c1920 = arith.constant 1920 : index
    %32 = vector.load %arg2[%c0_16, %c1920] : memref<8x2048xf32, #tpu.memory_space<vmem>>, vector<8x128xf32>
    %33 = arith.addf %31, %32 : vector<8x128xf32>
    %c0_17 = arith.constant 0 : index
    %c0_18 = arith.constant 0 : index
    %34 = vector.load %arg3[%c0_17, %c0_18] : memref<8x128xf32, #tpu.memory_space<vmem>>, vector<8x128xf32>
    %35 = arith.addf %34, %33 : vector<8x128xf32>
    %c0_19 = arith.constant 0 : index
    %c0_20 = arith.constant 0 : index
    %36 = vector.load %arg3[%c0_19, %c0_20] : memref<8x128xf32, #tpu.memory_space<vmem>>, vector<8x128xf32>
    tpu.vector_store %arg3[%c0_19, %c0_20], %35 {strides = array<i32>} : memref<8x128xf32, #tpu.memory_space<vmem>>, vector<8x128xf32>,
    return
  }
  func.func @transform_0(%arg0: i32, %arg1: i32) -> (i32, i32) {
    %c0_i32 = arith.constant 0 : i32
    return %arg0, %arg1 : i32, i32
  }
  func.func @transform_1(%arg0: i32, %arg1: i32) -> (i32, i32) {
    %c0_i32 = arith.constant 0 : i32
    %c0_i32_0 = arith.constant 0 : i32
    return %arg0, %c0_i32 : i32, i32
  }
}

</mosaic_0001>

<bundles_post_ra>
// kernel: attention3d_forward.2
= control target key start
LH: loop header
LB: loop body
LE: loop exit
PB: predicated region body
PF: predicated region fallthrough
CT: control target
= control target key end

     0   :  { %s317_s6 = smov 0   ;;  %s319_s7 = smov 0   ;;  %s374_s0 = inlined_call_operand.vmem [shape: f32[8,4096], index: 0, kind: input, shape index: {}]   ;;  %s375_s1 = inlined_call_operand.vmem [shape: f32[8,128], index: 1, kind: output, shape index: {}]  }
   0x1   :  { %s321_s8 = smov 0  }
   0x2 LB: > { %s20_s9 = sadd.s32 1, %s300_s7  ;;  %p250_p0 = scmp.ge.s32.totalorder %s304_s8, 1  ;;  %s304_s8 = sphi %s321_s8, %s11_s8   ;;  %s300_s7 = sphi %s319_s7, %s377_s7   ;;  %s296_s6 = sphi %s317_s6, %s376_s6  }
   0x3   : > { %p21_p1 = scmp.ge.s32.totalorder %s20_s9, 2  ;;  %p106_p2 = scmp.lt.s32.totalorder %s304_s8, 3 }
   0x5   : > { %s379_s9 = smov (%p21_p1, %s20_s9), 0  ;;  %p107_p3 = pnand %p250_p0, %p106_p2 }
   0x6   : > { %s251_s10 = sshll.u32 (!%p107_p3), %s296_s6, 4  ;;  %p253_p5 = scmp.ne.s32.totalorder (!%p107_p3), %s296_s6, 0 }
   0x7   : > { %110 = sbr.rel (%p107_p3) target bundleno = 55 (0x37), region = 24  ;;  %p132_p4 = scmp.lt.s32.totalorder (!%p107_p3), %s251_s10, 31 }
   0xe   : > { %s381_s10 = smov (!%p132_p4, %s251_s10), 31  ;;  %146 = sbr.rel (%p253_p5) target bundleno = 21 (0x15), region = 28 }
   0xf   : > { %s252_s11 = sshll.u32 %s381_s10, 3  ;;  %v306_v0 = vmov (!%p253_p5), 0.0  }
  0x10   : > { %s338_s14 = scalar_lea.vmem %s374_s0, %s252_s11  ;;  %147 = vst [vmem:[%s375_s1] sm:$0xff] (!%p253_p5), %v306_v0 }
  0x15 PF: > { %v148_v1 = vld [vmem:[%s338_s14] sm:$0xff]  ;;  %v149_v2 = vld [vmem:[%s338_s14 + $0x8] sm:$0xff]  ;;  %v151_v3 = vld [vmem:[%s338_s14 + $0x10] sm:$0xff] }
  0x16   : > { %v150_v4 = vadd.f32 %v149_v2, %v148_v1  ;;  %v153_v5 = vld [vmem:[%s338_s14 + $0x18] sm:$0xff]  ;;  %v155_v7 = vld [vmem:[%s338_s14 + $0x20] sm:$0xff]  ;;  %v157_v9 = vld [vmem:[%s338_s14 + $0x28] sm:$0xff] }
  0x17   : > { %v159_v11 = vld [vmem:[%s338_s14 + $0x30] sm:$0xff]  ;;  %v161_v13 = vld [vmem:[%s338_s14 + $0x38] sm:$0xff]  ;;  %v163_v15 = vld [vmem:[%s338_s14 + $0x40] sm:$0xff] }
  0x18   : > { %v152_v6 = vadd.f32 %v151_v3, %v150_v4  ;;  %v165_v17 = vld [vmem:[%s338_s14 + $0x48] sm:$0xff]  ;;  %v167_v19 = vld [vmem:[%s338_s14 + $0x50] sm:$0xff]  ;;  %v169_v21 = vld [vmem:[%s338_s14 + $0x58] sm:$0xff] }
  0x19   : > { %v171_v23 = vld [vmem:[%s338_s14 + $0x60] sm:$0xff]  ;;  %v173_v25 = vld [vmem:[%s338_s14 + $0x68] sm:$0xff]  ;;  %v175_v27 = vld [vmem:[%s338_s14 + $0x70] sm:$0xff] }
  0x1a   : > { %v154_v8 = vadd.f32 %v153_v5, %v152_v6  ;;  %v177_v29 = vld [vmem:[%s338_s14 + $0x78] sm:$0xff]  ;;  %v179_v31 = vld [vmem:[%s375_s1] sm:$0xff] }
  0x1c   : > { %v156_v10 = vadd.f32 %v155_v7, %v154_v8 }
  0x1e   : > { %v158_v12 = vadd.f32 %v157_v9, %v156_v10 }
  0x20   : > { %v160_v14 = vadd.f32 %v159_v11, %v158_v12 }
  0x22   : > { %v162_v16 = vadd.f32 %v161_v13, %v160_v14 }
  0x24   : > { %v164_v18 = vadd.f32 %v163_v15, %v162_v16 }
  0x26   : > { %v166_v20 = vadd.f32 %v165_v17, %v164_v18 }
  0x28   : > { %v168_v22 = vadd.f32 %v167_v19, %v166_v20 }
  0x2a   : > { %v170_v24 = vadd.f32 %v169_v21, %v168_v22 }
  0x2c   : > { %v172_v26 = vadd.f32 %v171_v23, %v170_v24 }
  0x2e   : > { %v174_v28 = vadd.f32 %v173_v25, %v172_v26 }
  0x30   : > { %v176_v30 = vadd.f32 %v175_v27, %v174_v28 }
  0x32   : > { %v178_v32 = vadd.f32 %v177_v29, %v176_v30 }
  0x34   : > { %v180_v33 = vadd.f32 %v179_v31, %v178_v32 }
  0x36   : > { %181 = vst [vmem:[%s375_s1] sm:$0xff] %v180_v33 }
  0x37 PF: > { %s11_s8 = sadd.s32 1, %s304_s8   ;;  %s376_s6 = smov %s300_s7 }
  0x38   : > { %p8_p6 = scmp.ge.s32.totalorder %s11_s8, 4   ;;  %s377_s7 = smov %s379_s9 }
  0x3a   :  { %10 = sbr.rel (!%p8_p6) target bundleno = 2 (0x2), region = 58 }

// kernel: attention3d_forward.3
= control target key start
LH: loop header
LB: loop body
LE: loop exit
PB: predicated region body
PF: predicated region fallthrough
CT: control target
= control target key end

     0   :  { %vm17_vm0 = vcmask 1043456   ;;  %s324_s0 = inlined_call_operand.vmem [shape: f32[2,4,128], index: 0, kind: input, shape index: {}]   ;;  %s325_s1 = inlined_call_operand.vmem [shape: f32[4,2], index: 1, kind: input, shape index: {}]   ;;  %s326_s2 = inlined_call_operand.vmem [shape: f32[2,4], index: 2, kind: input, shape index: {}]   ;;  %s327_s3 = inlined_call_operand.hbm [shape: f32[2,4], index: 3, kind: output, shape index: {}]  }
   0x1   :  { %v15_v0 = vld [vmem:[%s324_s0] sm:$0xf]  ;;  %v16_v1 = vld [vmem:[%s324_s0 + $0x4] sm:$0xf] }
   0x2   :  { %v18_v2 = vsel %vm17_vm0, %v15_v0, 0.0 }
   0x3   :  { %8 = vsyncpa [#allocation3], 0  ;;  %19 = vadd.xlane.f32.xlu0 %v18_v2  ;;  %v21_v3 = vsel %vm17_vm0, %v16_v1, 0.0  ;;  %v26_v4 = vld [vmem:[%s325_s1] sm:$0xf]  ;;  %v274_v5 = vmov 0.0   ;;  %v29_v6 = vlaneseq }
   0x4   :  { %233 = vmatprep.subr.mxu0 %v274_v5  ;;  %vm275_vm1 = vmmov 0   ;;  %238 = vmatprep.subr.mxu1 %v274_v5  ;;  %vm39_vm2 = vcmask 1041409   ;;  %vm41_vm3 = vcmask 31744   ;;  %v118_v17 = vld [vmem:[%s326_s2] sm:$0x3]  ;;  %vm123_vm4 = vcmask 1041408  }
   0x5   :  { %235 = vmatprep.mubr.msk.f32.mxu0 %vm275_vm1, %v274_v5  ;;  %234 = vmatpush3.msk.msra.mxu0 %vm17_vm0, %v26_v4  ;;  %v30_v7 = vand.u32 127, %v29_v6  ;;  %v32_v8 = vshrl.u32 %v29_v6, 7  ;;  %vm119_vm5 = vcmask 15360   ;;  %vm198_vm6 = vcmask 25600   ;;  %s276_s2 = smov [#allocation2]  }
   0x6   :  { %240 = vmatprep.mubr.msk.f32.mxu1 %vm275_vm1, %v274_v5  ;;  %239 = vmatpush3.msk.msra.mxu1 %vm123_vm4, %v118_v17  ;;  %s217_s18 = sshll.u32 %s276_s2, 4  ;;  %s218_s18 = int_to_ptr.vmem [resolvable:$true] %s217_s18 }
   0x7   :  { %22 = vadd.xlane.f32.xlu0 %v21_v3  ;;  %v33_v10 = vsub.s32 %v30_v7, %v32_v8  ;;  %s250_s19 = scalar_lea.vmem %s218_s18, 32  ;;  %p255_p1 = scmp.lt.s32.totalorder %s218_s18, %s218_s18 }
   0x8   :  { %p251_p0 = scmp.ne.s32.totalorder %s218_s18, %s250_s19  ;;  %p256_p2 = scmp.lt.s32.totalorder %s250_s19, %s250_s19 }
   0xa   :  { %p257_p3 = por %p256_p2, %p255_p1 }
   0xc   :  { %p258_p4 = pnand %p257_p3, %p251_p0 }
  0x90   :  { %v20_v9 = vpop.xlane.xlu0 %19 }
  0x91   :  { %v24_v11 = vmul.f32 0.00024414063, %v20_v9 }
  0x93   :  { %v34_v14 = vrot.slane %v24_v11, %v33_v10 }
  0x94   :  { %v23_v12 = vpop.xlane.xlu0 %22 }
  0x95   :  { %v25_v13 = vmul.f32 0.00024414063, %v23_v12 }
  0x97   :  { %v38_v15 = vrot.slane %v25_v13, %v33_v10 }
  0x99   :  { %v40_v16 = vsel %vm39_vm2, %v38_v15, %v34_v14 }
  0x9a   :  { %236 = vmatmul.mubr.msk.f32.vlgmr.msra.gmra.mrb[0].mxu0 %vm41_vm3, %v40_v16 }
 0x16d   :  { %v113_v18 = vpop.f32.mrb[0].mxu0 }
 0x16e   :  { %v117_v19 = vmax.f32 %v113_v18, 0.0  ;;  %v237_v20 = vpop.f32.mrb[1].mxu0 }
 0x170   :  { %241 = vmatmul.mubr.msk.f32.vlgmr.msra.gmra.mrb[0].mxu1 %vm119_vm5, %v117_v19 }
 0x243   :  { %v193_v21 = vpop.f32.mrb[0].mxu1 }
 0x244   :  { %v197_v22 = vmul.f32 0.032258064, %v193_v21  ;;  %v242_v23 = vpop.f32.mrb[1].mxu1 }
 0x246   :  { %v199_v24 = vsel %vm198_vm6, %v197_v22, -inf }
 0x247   :  { %200 = vmax.xlane.f32.xlu1 %v199_v24 }
 0x2d4   :  { %v201_v25 = vpop.xlane.xlu1 %200 }
 0x2d5   :  { %v202_v26 = vsub.f32 %v197_v22, %v201_v25 }
 0x2d7   :  { %v203_v27 = vmul.f32 1.442695, %v202_v26 }
 0x2d9   :  { %246 = vpow2.f32 %v203_v27 }
 0x2e3   :  { %v247_v28 = vpop.eup %246 }
 0x2e4   :  { %v205_v29 = vsel %vm198_vm6, %v247_v28, 0.0 }
 0x2e5   :  { %206 = vadd.xlane.f32.xlu1 %v205_v29 }
 0x372   :  { %v207_v30 = vpop.xlane.xlu1 %206 }
 0x373   :  { %248 = vrcp.f32 %v207_v30 }
 0x37d   :  { %v249_v31 = vpop.eup %248 }
 0x37e   :  { %v209_v32 = vmul.f32 %v249_v31, %v247_v28 }
 0x380   :  { %210 = vst.msk [vmem:[#allocation2] sm:$0x3] %vm198_vm6, %v209_v32 }
 0x381   :  { %261 = shalt.err (!%p258_p4)
}
 0x382   :  { %s262_s22 = scalar_lea.hbm %s327_s3, 32 }
 0x383   :  { %p263_p5 = scmp.ne.s32.totalorder %s327_s3, %s262_s22  ;;  %p266_p6 = scmp.lt.u32.totalorder %s262_s22, %s327_s3 }
 0x385   :  { %p268_p7 = pnand %p266_p6, %p263_p5 }
 0x387   :  { %271 = shalt.err (!%p268_p7)
}
 0x388   :  { %220 = dma.vmem_to_hbm [thread:$0]  %s218_s18, 32, %s327_s3, [#allocation3]  }
 0x389   :  { %272 = dma.done.wait [#allocation3], 32  }
 0x38a   :  { %273 = vsyncadd [#allocation3], 4294967264 }
 0x38b   :  { %224 = vsyncpa [#allocation3], 1 }

</bundles_post_ra>
